<compile_context>
chip_gen: v5e
topology: v5e:2x2
jax: 0.10.0
libtpu: 0.0.40
codegen_flags: <defaults>
</compile_context>

<pallas_src>
import functools

import jax
import jax.numpy as jnp
from jax.experimental import pallas as pl
from jax.experimental.pallas import tpu as pltpu


_MAX_LANE_TILE = 4096  # multiple of 128; a (1, 64, 4096) f32 block is ~1 MiB


def _round_up(x, m):
    return ((x + m - 1) // m) * m


# ---------------------------------------------------------------------------
# Pass 1: per-channel sum and sum-of-squares (accumulator across the grid)
# ---------------------------------------------------------------------------
def _bn_stats_kernel(x_ref, sum_ref, sumsq_ref):
    @pl.when((pl.program_id(0) == 0) & (pl.program_id(1) == 0))
    def _():
        sum_ref[...] = jnp.zeros_like(sum_ref)
        sumsq_ref[...] = jnp.zeros_like(sumsq_ref)

    x = x_ref[0]                                             # (C, TL) f32
    sum_ref[...] += jnp.sum(x, axis=-1, keepdims=True)       # (C, 1)
    sumsq_ref[...] += jnp.sum(x * x, axis=-1, keepdims=True)  # (C, 1)


# ---------------------------------------------------------------------------
# Pass 2: apply  gamma * (x - mean) * rsqrt(var + eps) + beta
# ---------------------------------------------------------------------------
def _bn_apply_kernel(x_ref, sum_ref, sumsq_ref, gamma_ref, beta_ref, o_ref,
                     *, count, eps):
    inv_count = 1.0 / count
    mean = sum_ref[...] * inv_count                          # (C, 1)
    var = jnp.maximum(sumsq_ref[...] * inv_count - mean * mean, 0.0)
    inv_std = jax.lax.rsqrt(var + eps)                       # EUP slot
    scale = gamma_ref[...] * inv_std                         # (C, 1)
    shift = beta_ref[...] - mean * scale                     # (C, 1)
    # x block (1, C, TL); broadcast the per-channel scale/shift over lanes.
    o_ref[...] = x_ref[...] * scale[None] + shift[None]


def batch_norm1d_forward(x, gamma, beta, use_bn=True, use_ibn=False, eps=1e-5):
    """Forward of the batch_norm1d module.

    x: (B, C, L) or (B, C) float array with C == gamma.shape[0] (64 here).
    """
    if not use_bn:
        if use_ibn:
            # TODO(synk): InstanceNorm1d (use_ibn) path not implemented in Pallas.
            raise NotImplementedError("use_ibn path not implemented")
        return x

    orig_2d = (x.ndim == 2)
    x3 = x[:, :, None] if orig_2d else x
    x3 = x3.astype(jnp.float32)
    B, C, L = x3.shape

    # Lane tiling: use the full L extent when it fits, otherwise 128-aligned
    # tiles with zero padding (zero columns do not perturb sum / sumsq).
    if L <= _MAX_LANE_TILE:
        tl, l_pad = L, L
    else:
        tl = _MAX_LANE_TILE
        l_pad = _round_up(L, tl)
    if l_pad != L:
        x3 = jnp.pad(x3, ((0, 0), (0, 0), (0, l_pad - L)))
    n_l = l_pad // tl
    count = float(B * L)  # true element count per channel (excludes padding)

    g2 = gamma.reshape(C, 1).astype(jnp.float32)
    b2 = beta.reshape(C, 1).astype(jnp.float32)

    x_spec = pl.BlockSpec((1, C, tl), lambda b, l: (b, 0, l))
    vec_spec = pl.BlockSpec((C, 1), lambda b, l: (0, 0))  # resident stats/affine

    sums, sumsqs = pl.pallas_call(
        _bn_stats_kernel,
        out_shape=(jax.ShapeDtypeStruct((C, 1), jnp.float32),
                   jax.ShapeDtypeStruct((C, 1), jnp.float32)),
        grid_spec=pltpu.PrefetchScalarGridSpec(
            num_scalar_prefetch=0,
            grid=(B, n_l),
            in_specs=[x_spec],
            out_specs=(vec_spec, vec_spec),
        ),
        compiler_params=pltpu.CompilerParams(
            dimension_semantics=("arbitrary", "arbitrary")),
    )(x3)

    out = pl.pallas_call(
        functools.partial(_bn_apply_kernel, count=count, eps=float(eps)),
        out_shape=jax.ShapeDtypeStruct((B, C, l_pad), jnp.float32),
        grid_spec=pltpu.PrefetchScalarGridSpec(
            num_scalar_prefetch=0,
            grid=(B, n_l),
            in_specs=[x_spec, vec_spec, vec_spec, vec_spec, vec_spec],
            out_specs=x_spec,
        ),
        compiler_params=pltpu.CompilerParams(
            dimension_semantics=("parallel", "parallel")),
    )(x3, sums, sumsqs, g2, b2)

    out = out[:, :, :L]
    if orig_2d:
        out = out[:, :, 0]
    return out


# ---------------------------------------------------------------------------
# Pure-JAX reference (PyTorch BatchNorm1d training-mode semantics)
# ---------------------------------------------------------------------------
def reference_forward(x, gamma, beta, eps=1e-5):
    if x.ndim == 2:
        axes, g, b = (0,), gamma[None, :], beta[None, :]
    else:
        axes, g, b = (0, 2), gamma[None, :, None], beta[None, :, None]
    mean = x.mean(axis=axes, keepdims=True)
    var = x.var(axis=axes, keepdims=True)          # biased, as PyTorch uses
    return g * (x - mean) / jnp.sqrt(var + eps) + b


if __name__ == "__main__":
    B, C, L = 2, 64, 16                            # BatchNorm1d(64) -> C must be 64

    key = jax.random.PRNGKey(0)
    x = jax.random.normal(key, (B, C, L), jnp.float32)
    gamma = jnp.ones((C,), jnp.float32)            # fresh nn.BatchNorm1d init
    beta = jnp.zeros((C,), jnp.float32)

    out = batch_norm1d_forward(x, gamma, beta, use_bn=True, use_ibn=False)
    out = jax.block_until_ready(out)

    ref = reference_forward(x, gamma, beta)
    assert out.shape == (B, C, L), out.shape
    assert jnp.allclose(out, ref, atol=1e-4, rtol=1e-4), "mismatch vs reference"

    print("KERNEL_OK")
</pallas_src>

<mosaic_0001>
module attributes {stable_mosaic.version = 11 : i64} {
  func.func @_bn_stats_kernel(%arg0: i32, %arg1: i32, %arg2: memref<1x64x16xf32, #tpu.memory_space<vmem>>, %arg3: memref<64x1xf32, #tpu.memory_space<vmem>>, %arg4: memref<64x1xf32, #tpu.memory_space<vmem>>) attributes {dimension_semantics = [#tpu.dimension_semantics<arbitrary>, #tpu.dimension_semantics<arbitrary>], iteration_bounds = array<i64: 2, 1>, scalar_prefetch = 0 : i64, scratch_operands = 0 : i64, tpu.core_type = #tpu.core_type<tc>, window_params = [{transform_indices = @transform_0, window_bounds = array<i64: 1, 64, 16>}, {pipeline_mode = #tpu.pipeline_mode<synchronous>, transform_indices = @transform_1, window_bounds = array<i64: 64, 1>}, {pipeline_mode = #tpu.pipeline_mode<synchronous>, transform_indices = @transform_2, window_bounds = array<i64: 64, 1>}]} {
    %c0_i32 = arith.constant 0 : i32
    %0 = arith.cmpi eq, %arg0, %c0_i32 : i32
    %c0_i32_0 = arith.constant 0 : i32
    %1 = arith.cmpi eq, %arg1, %c0_i32_0 : i32
    %2 = arith.andi %0, %1 : i1
    %3 = arith.extui %2 : i1 to i32
    %c0_i32_1 = arith.constant 0 : i32
    %4 = arith.cmpi ne, %3, %c0_i32_1 : i32
    scf.if %4 {
      %cst_13 = arith.constant 0.000000e+00 : f32
      %18 = vector.broadcast %cst_13 : f32 to vector<64x1xf32>
      %c0_14 = arith.constant 0 : index
      %c0_15 = arith.constant 0 : index
      %19 = vector.load %arg3[%c0_14, %c0_15] : memref<64x1xf32, #tpu.memory_space<vmem>>, vector<64x1xf32>
      tpu.vector_store %arg3[%c0_14, %c0_15], %18 {strides = array<i32>} : memref<64x1xf32, #tpu.memory_space<vmem>>, vector<64x1xf32>,
      %cst_16 = arith.constant 0.000000e+00 : f32
      %20 = vector.broadcast %cst_16 : f32 to vector<64x1xf32>
      %c0_17 = arith.constant 0 : index
      %c0_18 = arith.constant 0 : index
      %21 = vector.load %arg4[%c0_17, %c0_18] : memref<64x1xf32, #tpu.memory_space<vmem>>, vector<64x1xf32>
      tpu.vector_store %arg4[%c0_17, %c0_18], %20 {strides = array<i32>} : memref<64x1xf32, #tpu.memory_space<vmem>>, vector<64x1xf32>,
    } else {
    }
    %c0 = arith.constant 0 : index
    %c0_2 = arith.constant 0 : index
    %c0_3 = arith.constant 0 : index
    %5 = vector.load %arg2[%c0, %c0_2, %c0_3] : memref<1x64x16xf32, #tpu.memory_space<vmem>>, vector<1x64x16xf32>
    %6 = vector.shape_cast %5 : vector<1x64x16xf32> to vector<64x16xf32>
    %c0_4 = arith.constant 0 : index
    %c0_5 = arith.constant 0 : index
    %7 = vector.load %arg3[%c0_4, %c0_5] : memref<64x1xf32, #tpu.memory_space<vmem>>, vector<64x1xf32>
    %cst = arith.constant dense<0.000000e+00> : vector<64xf32>
    %8 = vector.multi_reduction <add>, %6, %cst [1] : vector<64x16xf32> to vector<64xf32>
    %9 = vector.shape_cast %8 : vector<64xf32> to vector<64x1xf32>
    %10 = arith.addf %7, %9 : vector<64x1xf32>
    %c0_6 = arith.constant 0 : index
    %c0_7 = arith.constant 0 : index
    %11 = vector.load %arg3[%c0_6, %c0_7] : memref<64x1xf32, #tpu.memory_space<vmem>>, vector<64x1xf32>
    tpu.vector_store %arg3[%c0_6, %c0_7], %10 {strides = array<i32>} : memref<64x1xf32, #tpu.memory_space<vmem>>, vector<64x1xf32>,
    %c0_8 = arith.constant 0 : index
    %c0_9 = arith.constant 0 : index
    %12 = vector.load %arg4[%c0_8, %c0_9] : memref<64x1xf32, #tpu.memory_space<vmem>>, vector<64x1xf32>
    %13 = arith.mulf %6, %6 : vector<64x16xf32>
    %cst_10 = arith.constant dense<0.000000e+00> : vector<64xf32>
    %14 = vector.multi_reduction <add>, %13, %cst_10 [1] : vector<64x16xf32> to vector<64xf32>
    %15 = vector.shape_cast %14 : vector<64xf32> to vector<64x1xf32>
    %16 = arith.addf %12, %15 : vector<64x1xf32>
    %c0_11 = arith.constant 0 : index
    %c0_12 = arith.constant 0 : index
    %17 = vector.load %arg4[%c0_11, %c0_12] : memref<64x1xf32, #tpu.memory_space<vmem>>, vector<64x1xf32>
    tpu.vector_store %arg4[%c0_11, %c0_12], %16 {strides = array<i32>} : memref<64x1xf32, #tpu.memory_space<vmem>>, vector<64x1xf32>,
    return
  }
  func.func @transform_0(%arg0: i32, %arg1: i32) -> (i32, i32, i32) {
    %c0_i32 = arith.constant 0 : i32
    %c0_i32_0 = arith.constant 0 : i32
    return %arg0, %c0_i32, %arg1 : i32, i32, i32
  }
  func.func @transform_1(%arg0: i32, %arg1: i32) -> (i32, i32) {
    %c0_i32 = arith.constant 0 : i32
    %c0_i32_0 = arith.constant 0 : i32
    %c0_i32_1 = arith.constant 0 : i32
    return %c0_i32, %c0_i32_0 : i32, i32
  }
  func.func @transform_2(%arg0: i32, %arg1: i32) -> (i32, i32) {
    %c0_i32 = arith.constant 0 : i32
    %c0_i32_0 = arith.constant 0 : i32
    %c0_i32_1 = arith.constant 0 : i32
    return %c0_i32, %c0_i32_0 : i32, i32
  }
}

</mosaic_0001>

<bundles_post_ra>
// kernel: tpu_custom_call.1
= control target key start
LH: loop header
LB: loop body
LE: loop exit
PB: predicated region body
PF: predicated region fallthrough
CT: control target
= control target key end

     0   :  { %s411_s9 = smov 0   ;;  %s413_s10 = smov 0   ;;  %s643_s0 = inlined_call_operand.vmem [shape: f32[2,64,16], index: 0, kind: input, shape index: {}]   ;;  %s644_s1 = inlined_call_operand.vmem [shape: f32[64,1], index: 1, kind: output, shape index: {0}]   ;;  %s645_s2 = inlined_call_operand.vmem [shape: f32[64,1], index: 2, kind: output, shape index: {1}]  }
   0x1   :  { %s415_s11 = smov 0  }
   0x2 LB: > { %s25_s12 = sadd.s32 1, %s389_s10  ;;  %p338_p0 = scmp.ge.s32.totalorder %s393_s11, 1  ;;  %s393_s11 = sphi %s415_s11, %s13_s11   ;;  %s389_s10 = sphi %s413_s10, %s647_s10   ;;  %s385_s9 = sphi %s411_s9, %s646_s9  }
   0x3   : > { %p27_p1 = scmp.ge.s32.totalorder %s25_s12, 2  ;;  %p122_p2 = scmp.lt.s32.totalorder %s393_s11, 3 }
   0x5   : > { %s649_s12 = smov (%p27_p1, %s25_s12), 0  ;;  %p123_p3 = pnand %p338_p0, %p122_p2 }
   0x6   : > { %p142_p4 = scmp.lt.s32.totalorder (!%p123_p3), %s385_s9, 1  ;;  %p150_p5 = scmp.eq.s32.totalorder (!%p123_p3), %s385_s9, 0 }
   0x7   : > { %126 = sbr.rel (%p123_p3) target bundleno = 190 (0xbe), region = 24 }
   0xc   : > { %s651_s9 = smov (!%p142_p4, %s385_s9), 1  ;;  %155 = sbr.rel (!%p150_p5) target bundleno = 29 (0x1d), region = 28  ;;  %vm156_vm0 = vcmask (%p150_p5), 7168   ;;  %v395_v0 = vmov (%p150_p5), 0.0  }
   0xd   : > { %s344_s13 = sshll.u32 %s651_s9, 6  ;;  %157 = vst.msk [vmem:[%s644_s1] sm:$0xff] (%p150_p5), %vm156_vm0, %v395_v0 }
   0xe   : > { %s432_s16 = scalar_lea.vmem %s643_s0, %s344_s13  ;;  %158 = vst.msk [vmem:[%s644_s1 + $0x8] sm:$0xff] (%p150_p5), %vm156_vm0, %v395_v0 }
   0xf   : > { %159 = vst.msk [vmem:[%s644_s1 + $0x10] sm:$0xff] (%p150_p5), %vm156_vm0, %v395_v0 }
  0x10   : > { %160 = vst.msk [vmem:[%s644_s1 + $0x18] sm:$0xff] (%p150_p5), %vm156_vm0, %v395_v0 }
  0x11   : > { %161 = vst.msk [vmem:[%s644_s1 + $0x20] sm:$0xff] %vm156_vm0, %v395_v0 }
  0x12   : > { %162 = vst.msk [vmem:[%s644_s1 + $0x28] sm:$0xff] %vm156_vm0, %v395_v0 }
  0x13   : > { %163 = vst.msk [vmem:[%s644_s1 + $0x30] sm:$0xff] %vm156_vm0, %v395_v0 }
  0x14   : > { %164 = vst.msk [vmem:[%s644_s1 + $0x38] sm:$0xff] %vm156_vm0, %v395_v0 }
  0x15   : > { %165 = vst.msk [vmem:[%s645_s2] sm:$0xff] %vm156_vm0, %v395_v0 }
  0x16   : > { %166 = vst.msk [vmem:[%s645_s2 + $0x8] sm:$0xff] %vm156_vm0, %v395_v0 }
  0x17   : > { %167 = vst.msk [vmem:[%s645_s2 + $0x10] sm:$0xff] %vm156_vm0, %v395_v0 }
  0x18   : > { %168 = vst.msk [vmem:[%s645_s2 + $0x18] sm:$0xff] %vm156_vm0, %v395_v0 }
  0x19   : > { %169 = vst.msk [vmem:[%s645_s2 + $0x20] sm:$0xff] %vm156_vm0, %v395_v0 }
  0x1a   : > { %170 = vst.msk [vmem:[%s645_s2 + $0x28] sm:$0xff] %vm156_vm0, %v395_v0 }
  0x1b   : > { %171 = vst.msk [vmem:[%s645_s2 + $0x30] sm:$0xff] %vm156_vm0, %v395_v0 }
  0x1c   : > { %172 = vst.msk [vmem:[%s645_s2 + $0x38] sm:$0xff] %vm156_vm0, %v395_v0 }
  0x1d PF: > { %v173_v1 = vld [vmem:[%s432_s16] sm:$0xff]  ;;  %vm189_vm1 = vcmask 130048   ;;  %v175_v3 = vld [vmem:[%s432_s16 + $0x10] sm:$0xff]  ;;  %v174_v7 = vld [vmem:[%s432_s16 + $0x8] sm:$0xff]  ;;  %vm222_vm2 = vcmask 7168  }
  0x1e   : > { %v177_v2 = vld [vmem:[%s432_s16 + $0x20] sm:$0xff]  ;;  %v190_v4 = vsel %vm189_vm1, %v173_v1, 0.0  ;;  %v196_v6 = vsel %vm189_vm1, %v175_v3, 0.0  ;;  %v178_v8 = vld [vmem:[%s432_s16 + $0x28] sm:$0xff]  ;;  %v176_v9 = vld [vmem:[%s432_s16 + $0x18] sm:$0xff]  ;;  %v193_v10 = vsel %vm189_vm1, %v174_v7, 0.0  ;;  %v239_v13 = vmul.f32 %v173_v1, %v173_v1 }
  0x1f   : > { %v202_v5 = vsel %vm189_vm1, %v177_v2, 0.0  ;;  %191 = vadd.xlane.f32.xlu0 %v190_v4  ;;  %197 = vadd.xlane.f32.xlu1 %v196_v6  ;;  %v205_v11 = vsel %vm189_vm1, %v178_v8, 0.0  ;;  %v199_v12 = vsel %vm189_vm1, %v176_v9, 0.0  ;;  %v179_v14 = vld [vmem:[%s432_s16 + $0x30] sm:$0xff]  ;;  %v180_v15 = vld [vmem:[%s432_s16 + $0x38] sm:$0xff]  ;;  %v240_v19 = vmul.f32 %v174_v7, %v174_v7  ;;  %v186_v43 = vld [vmem:[%s644_s1 + $0x28] sm:$0xff] }
  0x20   : > { %203 = vadd.xlane.f32.xlu2 %v202_v5  ;;  %v208_v16 = vsel %vm189_vm1, %v179_v14, 0.0  ;;  %v247_v17 = vsel %vm189_vm1, %v239_v13, 0.0  ;;  %v211_v18 = vsel %vm189_vm1, %v180_v15, 0.0  ;;  %v242_v20 = vmul.f32 %v176_v9, %v176_v9  ;;  %v181_v33 = vld [vmem:[%s644_s1] sm:$0xff]  ;;  %v187_v51 = vld [vmem:[%s644_s1 + $0x30] sm:$0xff]  ;;  %v188_v53 = vld [vmem:[%s644_s1 + $0x38] sm:$0xff] }
  0x21   : > { %v241_v21 = vmul.f32 %v175_v3, %v175_v3  ;;  %v250_v22 = vsel %vm189_vm1, %v240_v19, 0.0  ;;  %v243_v25 = vmul.f32 %v177_v2, %v177_v2  ;;  %v245_v26 = vmul.f32 %v179_v14, %v179_v14  ;;  %v182_v42 = vld [vmem:[%s644_s1 + $0x8] sm:$0xff]  ;;  %v231_v52 = vld [vmem:[%s645_s2] sm:$0xff]  ;;  %v234_v61 = vld [vmem:[%s645_s2 + $0x18] sm:$0xff] }
  0x22   : > { %v256_v23 = vsel %vm189_vm1, %v242_v20, 0.0  ;;  %v244_v27 = vmul.f32 %v178_v8, %v178_v8  ;;  %v246_v31 = vmul.f32 %v180_v15, %v180_v15  ;;  %v183_v35 = vld [vmem:[%s644_s1 + $0x10] sm:$0xff]  ;;  %v232_v60 = vld [vmem:[%s645_s2 + $0x8] sm:$0xff]  ;;  %v235_v5 = vld [vmem:[%s645_s2 + $0x20] sm:$0xff] }
  0x23   : > { %v253_v24 = vsel %vm189_vm1, %v241_v21, 0.0  ;;  %v259_v28 = vsel %vm189_vm1, %v243_v25, 0.0  ;;  %v265_v29 = vsel %vm189_vm1, %v245_v26, 0.0  ;;  %v184_v44 = vld [vmem:[%s644_s1 + $0x18] sm:$0xff]  ;;  %v233_v62 = vld [vmem:[%s645_s2 + $0x10] sm:$0xff]  ;;  %v236_v7 = vld [vmem:[%s645_s2 + $0x28] sm:$0xff] }
  0x24   : > { %v262_v30 = vsel %vm189_vm1, %v244_v27, 0.0  ;;  %v268_v32 = vsel %vm189_vm1, %v246_v31, 0.0  ;;  %v185_v34 = vld [vmem:[%s644_s1 + $0x20] sm:$0xff]  ;;  %v237_v6 = vld [vmem:[%s645_s2 + $0x30] sm:$0xff]  ;;  %v238_v14 = vld [vmem:[%s645_s2 + $0x38] sm:$0xff] }
  0x27   : > { %194 = vadd.xlane.f32.xlu0 %v193_v10  ;;  %200 = vadd.xlane.f32.xlu1 %v199_v12 }
  0x28   : > { %206 = vadd.xlane.f32.xlu2 %v205_v11 }
  0x2f   : > { %209 = vadd.xlane.f32.xlu0 %v208_v16  ;;  %212 = vadd.xlane.f32.xlu1 %v211_v18 }
  0x30   : > { %248 = vadd.xlane.f32.xlu2 %v247_v17 }
  0x37   : > { %251 = vadd.xlane.f32.xlu0 %v250_v22  ;;  %254 = vadd.xlane.f32.xlu1 %v253_v24 }
  0x38   : > { %257 = vadd.xlane.f32.xlu2 %v256_v23 }
  0x3f   : > { %260 = vadd.xlane.f32.xlu0 %v259_v28  ;;  %263 = vadd.xlane.f32.xlu1 %v262_v30 }
  0x40   : > { %266 = vadd.xlane.f32.xlu2 %v265_v29 }
  0x47   : > { %269 = vadd.xlane.f32.xlu0 %v268_v32 }
  0x92   : > { %v192_v36 = vpop.xlane.xlu0 %191  ;;  %v198_v40 = vpop.xlane.xlu1 %197 }
  0x93   : > { %v204_v37 = vpop.xlane.xlu2 %203  ;;  %v214_v38 = vadd.f32 %v192_v36, %v181_v33  ;;  %v216_v41 = vadd.f32 %v198_v40, %v183_v35 }
  0x94   : > { %v218_v39 = vadd.f32 %v204_v37, %v185_v34 }
  0x95   : > { %223 = vst.msk [vmem:[%s644_s1] sm:$0xff] %vm222_vm2, %v214_v38 }
  0x96   : > { %227 = vst.msk [vmem:[%s644_s1 + $0x20] sm:$0xff] %vm222_vm2, %v218_v39 }
  0x97   : > { %225 = vst.msk [vmem:[%s644_s1 + $0x10] sm:$0xff] %vm222_vm2, %v216_v41 }
  0x9a   : > { %v195_v45 = vpop.xlane.xlu0 %194  ;;  %v201_v49 = vpop.xlane.xlu1 %200 }
  0x9b   : > { %v207_v46 = vpop.xlane.xlu2 %206  ;;  %v215_v47 = vadd.f32 %v195_v45, %v182_v42  ;;  %v217_v50 = vadd.f32 %v201_v49, %v184_v44 }
  0x9c   : > { %v219_v48 = vadd.f32 %v207_v46, %v186_v43 }
  0x9d   : > { %224 = vst.msk [vmem:[%s644_s1 + $0x8] sm:$0xff] %vm222_vm2, %v215_v47 }
  0x9e   : > { %228 = vst.msk [vmem:[%s644_s1 + $0x28] sm:$0xff] %vm222_vm2, %v219_v48 }
  0x9f   : > { %226 = vst.msk [vmem:[%s644_s1 + $0x18] sm:$0xff] %vm222_vm2, %v217_v50 }
  0xa2   : > { %v210_v54 = vpop.xlane.xlu0 %209  ;;  %v213_v57 = vpop.xlane.xlu1 %212 }
  0xa3   : > { %v249_v55 = vpop.xlane.xlu2 %248  ;;  %v220_v56 = vadd.f32 %v210_v54, %v187_v51  ;;  %v221_v59 = vadd.f32 %v213_v57, %v188_v53 }
  0xa4   : > { %v271_v58 = vadd.f32 %v249_v55, %v231_v52 }
  0xa5   : > { %229 = vst.msk [vmem:[%s644_s1 + $0x30] sm:$0xff] %vm222_vm2, %v220_v56 }
  0xa6   : > { %230 = vst.msk [vmem:[%s644_s1 + $0x38] sm:$0xff] %vm222_vm2, %v221_v59 }
  0xa7   : > { %279 = vst.msk [vmem:[%s645_s2] sm:$0xff] %vm222_vm2, %v271_v58 }
  0xaa   : > { %v252_v63 = vpop.xlane.xlu0 %251  ;;  %v255_v2 = vpop.xlane.xlu1 %254 }
  0xab   : > { %v258_v0 = vpop.xlane.xlu2 %257  ;;  %v272_v1 = vadd.f32 %v252_v63, %v232_v60  ;;  %v273_v4 = vadd.f32 %v255_v2, %v233_v62 }
  0xac   : > { %v274_v3 = vadd.f32 %v258_v0, %v234_v61 }
  0xad   : > { %280 = vst.msk [vmem:[%s645_s2 + $0x8] sm:$0xff] %vm222_vm2, %v272_v1 }
  0xae   : > { %281 = vst.msk [vmem:[%s645_s2 + $0x10] sm:$0xff] %vm222_vm2, %v273_v4 }
  0xaf   : > { %282 = vst.msk [vmem:[%s645_s2 + $0x18] sm:$0xff] %vm222_vm2, %v274_v3 }
  0xb2   : > { %v261_v8 = vpop.xlane.xlu0 %260  ;;  %v264_v11 = vpop.xlane.xlu1 %263 }
  0xb3   : > { %v267_v9 = vpop.xlane.xlu2 %266  ;;  %v275_v10 = vadd.f32 %v261_v8, %v235_v5  ;;  %v276_v13 = vadd.f32 %v264_v11, %v236_v7 }
  0xb4   : > { %v277_v12 = vadd.f32 %v267_v9, %v237_v6 }
  0xb5   : > { %283 = vst.msk [vmem:[%s645_s2 + $0x20] sm:$0xff] %vm222_vm2, %v275_v10 }
  0xb6   : > { %284 = vst.msk [vmem:[%s645_s2 + $0x28] sm:$0xff] %vm222_vm2, %v276_v13 }
  0xb7   : > { %285 = vst.msk [vmem:[%s645_s2 + $0x30] sm:$0xff] %vm222_vm2, %v277_v12 }
  0xba   : > { %v270_v15 = vpop.xlane.xlu0 %269 }
  0xbb   : > { %v278_v16 = vadd.f32 %v270_v15, %v238_v14 }
  0xbd   : > { %286 = vst.msk [vmem:[%s645_s2 + $0x38] sm:$0xff] %vm222_vm2, %v278_v16 }
  0xbe PF: > { %s13_s11 = sadd.s32 1, %s393_s11   ;;  %s646_s9 = smov %s389_s10 }
  0xbf   : > { %p10_p6 = scmp.ge.s32.totalorder %s13_s11, 4   ;;  %s647_s10 = smov %s649_s12 }
  0xc1   :  { %12 = sbr.rel (!%p10_p6) target bundleno = 2 (0x2), region = 62 }

</bundles_post_ra>
